<compile_context>
chip_gen: v5e
topology: v5e:2x2
jax: 0.10.0
libtpu: 0.0.40
codegen_flags: <defaults>
</compile_context>

<pallas_src>
import functools
import math

import jax
import jax.numpy as jnp
from jax import lax
from jax.experimental import pallas as pl
from jax.experimental.pallas import tpu as pltpu

_LANE = 128
_MAX_BLOCK_ROWS = 8192                  # (8192, 128) f32 block = 4 MiB per buffer
_VMEM_LIMIT_BYTES = 48 * 1024 * 1024    # covers double-buffered inputs on all chips


def _make_pow(gamma):
    """Integer gamma -> repeated multiplies on the VPU (no exp/log pow)."""
    if float(gamma).is_integer():
        n = int(gamma)
        return lambda x: lax.integer_pow(x, n)
    g = jnp.float32(gamma)
    return lambda x: x ** g


def _elem_loss(p, t, alpha, gamma, logits):
    """Per-element focal loss: single clip + single log restructure.

    Algebraically identical to the PyTorch forward:
      t == 1 : -alpha    *(1-pc)^g*log(pc)   + (1-alpha)*C
      t == 0 : -(1-alpha)*  pc^g  *log(1-pc) + alpha    *C
      else   : C
    with pc = clip(p, 0.001, 0.999) and C = -(0.001^g)*log(0.999) (the fully
    clamped inactive branch of the original two-branch form).
    """
    if logits:
        p = jax.nn.sigmoid(p)
    pc = jnp.clip(p, 0.001, 0.999)
    one_minus_pc = 1.0 - pc
    is_pos = t == 1.0
    is_neg = t == 0.0

    x = jnp.where(is_pos, pc, one_minus_pc)        # argument of the single log
    base = jnp.where(is_pos, one_minus_pc, pc)     # base of the pow factor
    active = -_make_pow(gamma)(base) * jnp.log(x)  # one EUP log per element

    a = float(alpha)
    a_ = 1.0 - float(alpha)
    c_other = -(0.001 ** float(gamma)) * math.log(0.999)   # compile-time constant

    coef = jnp.where(is_pos, jnp.float32(a),
                     jnp.where(is_neg, jnp.float32(a_), jnp.float32(0.0)))
    const = jnp.where(is_pos, jnp.float32(a_ * c_other),
                      jnp.where(is_neg, jnp.float32(a * c_other),
                                jnp.float32(c_other)))
    # select-then-multiply: garbage (NaN) rows in boundary blocks stay confined
    # to `loss` and are removed by the row-mask *select* in the kernel.
    return coef * active + const


def _focal_partial_sum_kernel(pred_ref, true_ref, out_ref, *,
                              alpha, gamma, logits, need_row_mask,
                              valid_last_rows):
    """Writes one (1, 128) per-block partial sum; no resident accumulator."""
    p = pred_ref[...].astype(jnp.float32)
    t = true_ref[...].astype(jnp.float32)
    loss = _elem_loss(p, t, alpha, gamma, logits)

    if need_row_mask:
        step = pl.program_id(0)
        last = pl.num_programs(0) - 1

        @pl.when(step != last)
        def _():
            out_ref[...] = jnp.sum(loss, axis=0, keepdims=True)

        @pl.when(step == last)
        def _():
            # Row-threshold mask only on the ragged final block (select, never
            # arithmetic with the boundary-block garbage).
            row_ids = lax.broadcasted_iota(jnp.int32, loss.shape, 0)
            masked = jnp.where(row_ids < valid_last_rows, loss, jnp.float32(0.0))
            out_ref[...] = jnp.sum(masked, axis=0, keepdims=True)
    else:
        out_ref[...] = jnp.sum(loss, axis=0, keepdims=True)


def _focal_elementwise_kernel(pred_ref, true_ref, out_ref, *,
                              alpha, gamma, logits):
    """Per-element focal loss (sampling=None path)."""
    p = pred_ref[...].astype(jnp.float32)
    t = true_ref[...].astype(jnp.float32)
    out_ref[...] = _elem_loss(p, t, alpha, gamma, logits)


def focal_loss(y_pred, y_true, *, alpha=0.2, gamma=2, logits=False,
               sampling='mean'):
    """JAX/Pallas equivalent of FocalLoss.forward."""
    assert y_pred.shape == y_true.shape
    y_pred = jnp.asarray(y_pred)
    y_true = jnp.asarray(y_true)
    n_elem = int(math.prod(y_pred.shape))

    # Binary 0/1 targets are exactly representable in bf16: lossless narrowing
    # that cuts streamed HBM bytes/elem.  (Assumes targets are binary/soft and
    # do not rely on sub-bf16 precision for the ==1 / ==0 tests.)
    if jnp.issubdtype(y_true.dtype, jnp.floating) and y_true.dtype != jnp.bfloat16:
        y_true = y_true.astype(jnp.bfloat16)

    pred_flat = y_pred.reshape(-1)
    true_flat = y_true.reshape(-1)

    if sampling in ('mean', 'sum'):
        main = (n_elem // _LANE) * _LANE
        rows_main = main // _LANE
        total = jnp.float32(0.0)

        if rows_main > 0:
            if main == n_elem:
                pred2d = pred_flat.reshape(rows_main, _LANE)   # free reshape
                true2d = true_flat.reshape(rows_main, _LANE)
            else:
                # Ragged lane tail: slice off the aligned head (no full-array
                # zero-pad; the <128-elem tail is handled below in plain jnp).
                pred2d = pred_flat[:main].reshape(rows_main, _LANE)
                true2d = true_flat[:main].reshape(rows_main, _LANE)

            block_rows = rows_main if rows_main <= _MAX_BLOCK_ROWS else _MAX_BLOCK_ROWS
            n_blocks = -(-rows_main // block_rows)
            need_row_mask = (n_blocks * block_rows) != rows_main
            valid_last_rows = rows_main - (n_blocks - 1) * block_rows

            kern = functools.partial(
                _focal_partial_sum_kernel, alpha=alpha, gamma=gamma,
                logits=logits, need_row_mask=need_row_mask,
                valid_last_rows=valid_last_rows)
            partials = pl.pallas_call(
                kern,
                out_shape=jax.ShapeDtypeStruct((n_blocks, _LANE), jnp.float32),
                grid=(n_blocks,),
                in_specs=[
                    pl.BlockSpec((block_rows, _LANE), lambda i: (i, 0)),
                    pl.BlockSpec((block_rows, _LANE), lambda i: (i, 0)),
                ],
                out_specs=pl.BlockSpec((1, _LANE), lambda i: (i, 0)),
                compiler_params=pltpu.CompilerParams(
                    dimension_semantics=("parallel",),
                    vmem_limit_bytes=_VMEM_LIMIT_BYTES),
            )(pred2d, true2d)
            total = jnp.sum(partials)          # tiny: n_blocks x 128 f32

        if main != n_elem:
            # <128-element ragged tail done with plain jnp (same math).
            tail_p = pred_flat[main:].astype(jnp.float32)
            tail_t = true_flat[main:].astype(jnp.float32)
            total = total + jnp.sum(_elem_loss(tail_p, tail_t, alpha, gamma,
                                               logits))

        if sampling == 'mean':
            return total / jnp.float32(n_elem)
        return total

    elif sampling is None:
        # Elementwise path must materialize the full output anyway; a tiny pad
        # of the last row is acceptable here.
        rows = -(-n_elem // _LANE)
        padded_len = rows * _LANE
        if padded_len != n_elem:
            pred_flat = jnp.pad(pred_flat, (0, padded_len - n_elem))
            true_flat = jnp.pad(true_flat, (0, padded_len - n_elem))
        pred2d = pred_flat.reshape(rows, _LANE)
        true2d = true_flat.reshape(rows, _LANE)

        block_rows = rows if rows <= _MAX_BLOCK_ROWS else _MAX_BLOCK_ROWS
        n_blocks = -(-rows // block_rows)

        kern = functools.partial(_focal_elementwise_kernel, alpha=alpha,
                                 gamma=gamma, logits=logits)
        loss2d = pl.pallas_call(
            kern,
            out_shape=jax.ShapeDtypeStruct((rows, _LANE), jnp.float32),
            grid=(n_blocks,),
            in_specs=[
                pl.BlockSpec((block_rows, _LANE), lambda i: (i, 0)),
                pl.BlockSpec((block_rows, _LANE), lambda i: (i, 0)),
            ],
            out_specs=pl.BlockSpec((block_rows, _LANE), lambda i: (i, 0)),
            compiler_params=pltpu.CompilerParams(
                dimension_semantics=("parallel",),
                vmem_limit_bytes=_VMEM_LIMIT_BYTES),
        )(pred2d, true2d)
        return loss2d.reshape(-1)[:n_elem].reshape(y_pred.shape)

    else:
        raise ValueError(f"unknown sampling: {sampling}")


def _reference_focal_loss(y_pred, y_true, alpha=0.2, gamma=2, logits=False,
                          sampling='mean'):
    """Pure-JAX reference mirroring the PyTorch forward (original two-log form)."""
    p = y_pred.astype(jnp.float32)
    t = y_true.astype(jnp.float32)
    if logits:
        p = jax.nn.sigmoid(p)
    pt_pos = jnp.clip(jnp.where(t == 1, p, jnp.ones_like(p)), 0.001, 0.999)
    pt_neg = jnp.clip(jnp.where(t == 0, p, jnp.zeros_like(p)), 0.001, 0.999)
    loss = (-alpha * (1 - pt_pos) ** gamma * jnp.log(pt_pos)
            - (1 - alpha) * pt_neg ** gamma * jnp.log(1 - pt_neg))
    if sampling == 'mean':
        return loss.mean()
    if sampling == 'sum':
        return loss.sum()
    return loss


if __name__ == "__main__":
    key = jax.random.PRNGKey(0)
    k1, k2 = jax.random.split(key)

    # Small NCHW-like shape: batch=2, channels=4, spatial=16x16
    shape = (2, 4, 16, 16)
    y_pred = jax.random.uniform(k1, shape, dtype=jnp.float32,
                                minval=0.0, maxval=1.0)
    y_true = (jax.random.uniform(k2, shape, dtype=jnp.float32)
              > 0.5).astype(jnp.float32)

    out = focal_loss(y_pred, y_true, alpha=0.2, gamma=2, logits=False,
                     sampling='mean')
    out = jax.block_until_ready(out)
    ref = _reference_focal_loss(y_pred, y_true)
    assert jnp.allclose(out, ref, rtol=1e-5, atol=1e-6), (out, ref)

    # Elementwise (sampling=None) path.
    out_el = jax.block_until_ready(focal_loss(y_pred, y_true, sampling=None))
    ref_el = _reference_focal_loss(y_pred, y_true, sampling=None)
    assert jnp.allclose(out_el, ref_el, rtol=1e-5, atol=1e-5), "elementwise mismatch"

    # Ragged / tail path: 3315 elements -> 25 aligned rows + 115-element tail.
    shape2 = (3, 5, 17, 13)
    y_pred2 = jax.random.uniform(k1, shape2, dtype=jnp.float32)
    y_true2 = (jax.random.uniform(k2, shape2, dtype=jnp.float32)
               > 0.5).astype(jnp.float32)
    out2 = jax.block_until_ready(focal_loss(y_pred2, y_true2, sampling='sum'))
    ref2 = _reference_focal_loss(y_pred2, y_true2, sampling='sum')
    assert jnp.allclose(out2, ref2, rtol=1e-4, atol=1e-3), (out2, ref2)

    print("KERNEL_OK")
</pallas_src>

<mosaic_0001>
module attributes {stable_mosaic.version = 11 : i64} {
  func.func @_focal_partial_sum_kernel(%arg0: i32, %arg1: memref<16x128xf32, #tpu.memory_space<vmem>>, %arg2: memref<16x128xbf16, #tpu.memory_space<vmem>>, %arg3: memref<1x128xf32, #tpu.memory_space<vmem>>) attributes {dimension_semantics = [#tpu.dimension_semantics<parallel>], iteration_bounds = array<i64: 1>, scalar_prefetch = 0 : i64, scratch_operands = 0 : i64, tpu.core_type = #tpu.core_type<tc>, window_params = [{transform_indices = @transform_0, window_bounds = array<i64: 16, 128>}, {transform_indices = @transform_1, window_bounds = array<i64: 16, 128>}, {transform_indices = @transform_2, window_bounds = array<i64: 1, 128>}]} {
    %c0 = arith.constant 0 : index
    %c0_0 = arith.constant 0 : index
    %0 = vector.load %arg1[%c0, %c0_0] : memref<16x128xf32, #tpu.memory_space<vmem>>, vector<16x128xf32>
    %c0_1 = arith.constant 0 : index
    %c0_2 = arith.constant 0 : index
    %1 = vector.load %arg2[%c0_1, %c0_2] : memref<16x128xbf16, #tpu.memory_space<vmem>>, vector<16x128xbf16>
    %2 = arith.extf %1 : vector<16x128xbf16> to vector<16x128xf32>
    %cst = arith.constant 1.000000e-03 : f32
    %cst_3 = arith.constant 9.990000e-01 : f32
    %3 = vector.broadcast %cst : f32 to vector<16x128xf32>
    %4 = arith.maximumf %3, %0 : vector<16x128xf32>
    %5 = vector.broadcast %cst_3 : f32 to vector<16x128xf32>
    %6 = arith.minimumf %5, %4 : vector<16x128xf32>
    %cst_4 = arith.constant 1.000000e+00 : f32
    %7 = vector.broadcast %cst_4 : f32 to vector<16x128xf32>
    %8 = arith.subf %7, %6 : vector<16x128xf32>
    %cst_5 = arith.constant 1.000000e+00 : f32
    %9 = vector.broadcast %cst_5 : f32 to vector<16x128xf32>
    %10 = arith.cmpf oeq, %2, %9 : vector<16x128xf32>
    %cst_6 = arith.constant 0.000000e+00 : f32
    %11 = vector.broadcast %cst_6 : f32 to vector<16x128xf32>
    %12 = arith.cmpf oeq, %2, %11 : vector<16x128xf32>
    %13 = arith.select %10, %6, %8 : vector<16x128xi1>, vector<16x128xf32>
    %14 = arith.select %10, %8, %6 : vector<16x128xi1>, vector<16x128xf32>
    %15 = arith.mulf %14, %14 : vector<16x128xf32>
    %cst_7 = arith.constant 0.000000e+00 : f32
    %16 = vector.broadcast %cst_7 : f32 to vector<16x128xf32>
    %17 = arith.subf %16, %15 : vector<16x128xf32>
    %18 = math.log %13 : vector<16x128xf32>
    %19 = arith.mulf %17, %18 : vector<16x128xf32>
    %cst_8 = arith.constant 8.000000e-01 : f32
    %cst_9 = arith.constant 0.000000e+00 : f32
    %20 = vector.broadcast %cst_8 : f32 to vector<16x128xf32>
    %21 = vector.broadcast %cst_9 : f32 to vector<16x128xf32>
    %22 = arith.select %12, %20, %21 : vector<16x128xi1>, vector<16x128xf32>
    %cst_10 = arith.constant 2.000000e-01 : f32
    %23 = vector.broadcast %cst_10 : f32 to vector<16x128xf32>
    %24 = arith.select %10, %23, %22 : vector<16x128xi1>, vector<16x128xf32>
    %cst_11 = arith.constant 2.00100062E-10 : f32
    %cst_12 = arith.constant 1.00050035E-9 : f32
    %25 = vector.broadcast %cst_11 : f32 to vector<16x128xf32>
    %26 = vector.broadcast %cst_12 : f32 to vector<16x128xf32>
    %27 = arith.select %12, %25, %26 : vector<16x128xi1>, vector<16x128xf32>
    %cst_13 = arith.constant 8.00400246E-10 : f32
    %28 = vector.broadcast %cst_13 : f32 to vector<16x128xf32>
    %29 = arith.select %10, %28, %27 : vector<16x128xi1>, vector<16x128xf32>
    %30 = arith.mulf %24, %19 : vector<16x128xf32>
    %31 = arith.addf %30, %29 : vector<16x128xf32>
    %cst_14 = arith.constant dense<0.000000e+00> : vector<128xf32>
    %32 = vector.multi_reduction <add>, %31, %cst_14 [0] : vector<16x128xf32> to vector<128xf32>
    %33 = vector.shape_cast %32 : vector<128xf32> to vector<1x128xf32>
    %c0_15 = arith.constant 0 : index
    %c0_16 = arith.constant 0 : index
    %34 = vector.load %arg3[%c0_15, %c0_16] : memref<1x128xf32, #tpu.memory_space<vmem>>, vector<1x128xf32>
    tpu.vector_store %arg3[%c0_15, %c0_16], %33 {strides = array<i32>} : memref<1x128xf32, #tpu.memory_space<vmem>>, vector<1x128xf32>,
    return
  }
  func.func @transform_0(%arg0: i32) -> (i32, i32) {
    %c0_i32 = arith.constant 0 : i32
    %c0_i32_0 = arith.constant 0 : i32
    return %arg0, %c0_i32 : i32, i32
  }
  func.func @transform_1(%arg0: i32) -> (i32, i32) {
    %c0_i32 = arith.constant 0 : i32
    %c0_i32_0 = arith.constant 0 : i32
    return %arg0, %c0_i32 : i32, i32
  }
  func.func @transform_2(%arg0: i32) -> (i32, i32) {
    %c0_i32 = arith.constant 0 : i32
    %c0_i32_0 = arith.constant 0 : i32
    return %arg0, %c0_i32 : i32, i32
  }
}

</mosaic_0001>

<bundles_post_ra>
// kernel: tpu_custom_call.1
= control target key start
LH: loop header
LB: loop body
LE: loop exit
PB: predicated region body
PF: predicated region fallthrough
CT: control target
= control target key end

     0   :  { %7 = vsyncpa [#allocation3], 0  ;;  %s264_s0 = inlined_call_operand.hbm [shape: f32[16,128], index: 0, kind: input, shape index: {}]   ;;  %s265_s1 = inlined_call_operand.hbm [shape: bf16[16,128], index: 1, kind: input, shape index: {}]   ;;  %s266_s2 = inlined_call_operand.hbm [shape: f32[1,128], index: 2, kind: output, shape index: {}]  }
   0x1   :  { %8 = vsyncpa [#allocation6], 0 }
   0x2   :  { %9 = vsyncpa [#allocation4], 0  ;;  %s14_s11 = sshll.u32 %s264_s0, 4  ;;  %s207_s12 = smov [#allocation2]   ;;  %s15_s11 = int_to_ptr.hbm [resolvable:$true] %s14_s11 }
   0x3   :  { %s16_s13 = sshll.u32 %s207_s12, 4  ;;  %s27_s16 = sshll.u32 %s265_s1, 4  ;;  %s17_s13 = int_to_ptr.vmem [resolvable:$true] %s16_s13  ;;  %s28_s16 = int_to_ptr.hbm [resolvable:$true] %s27_s16 }
   0x4   :  { %s208_s17 = smov 128   ;;  %s209_s18 = smov 8  }
   0x5   :  { %22 = dma.hbm_to_vmem [thread:$0]  %s15_s11, 256, %s17_s13, [#allocation3], %s208_s17, %s208_s17, %s209_s18  }
   0x6   :  { %s210_s19 = smov [#allocation5]   ;;  %s211_s21 = smov 64  }
   0x7   :  { %s29_s20 = sshll.u32 %s210_s19, 4  ;;  %s212_s22 = smov 4   ;;  %s30_s20 = int_to_ptr.vmem [resolvable:$true] %s29_s20 }
   0x8   :  { %35 = dma.hbm_to_vmem [thread:$0]  %s28_s16, 128, %s30_s20, [#allocation6], %s211_s21, %s211_s21, %s212_s22  }
   0x9   :  { %201 = dma.done.wait [#allocation3], 256  }
   0xa   :  { %202 = vsyncadd [#allocation3], 4294967040 }
   0xb   :  { %203 = dma.done.wait [#allocation6], 128  }
   0xc   :  { %204 = vsyncadd [#allocation6], 4294967168  ;;  %v44_v0 = vld [vmem:[#allocation2] sm:$0xff]  ;;  %v45_v1 = vld [vmem:[#allocation2 + $0x8] sm:$0xff]  ;;  %v213_v20 = vmov 0.0   ;;  %s215_s0 = smov [#allocation7]  }
   0xd   :  { %v113_v2 = vld [vmem:[#allocation5] sm:$0xff]   ;;  %v50_v5 = vmax.f32 %v44_v0, 0.001  ;;  %v51_v6 = vmax.f32 %v45_v1, 0.001  ;;  %s99_s1 = sshll.u32 %s215_s0, 4  ;;  %s100_s1 = int_to_ptr.vmem [resolvable:$true] %s99_s1 }
   0xe   :  { %v114_v3 = vunpack.c.l.bf16 %v113_v2  ;;  %v115_v4 = vunpack.c.h.bf16 %v113_v2  ;;  %v214_v27 = vmov 1.0005003e-09   ;;  %s101_s25 = sshll.u32 %s266_s2, 4  ;;  %s102_s25 = int_to_ptr.hbm [resolvable:$true] %s101_s25 }
   0xf   :  { %v52_v7 = vmin.f32 %v50_v5, 0.999  ;;  %v53_v8 = vmin.f32 %v51_v6, 0.999 }
  0x10   :  { %vm237_vm0 = vcmp.eq.f32.partialorder %v114_v3, 1.0  ;;  %vm241_vm1 = vcmp.eq.f32.partialorder %v115_v4, 1.0  ;;  %vm58_vm2 = vcmp.eq.f32.partialorder %v114_v3, 0.0  ;;  %vm59_vm3 = vcmp.eq.f32.partialorder %v115_v4, 0.0 }
  0x11   :  { %v54_v11 = vsub.f32 1.0, %v52_v7  ;;  %v55_v12 = vsub.f32 1.0, %v53_v8  ;;  %v74_v21 = vsel %vm58_vm2, 0.8, %v213_v20  ;;  %v75_v24 = vsel %vm59_vm3, 0.8, %v213_v20 }
  0x12   :  { %v78_v28 = vsel %vm58_vm2, 2.0010006e-10, %v214_v27  ;;  %v76_v30 = vsel %vm237_vm0, 0.2, %v74_v21  ;;  %v79_v31 = vsel %vm59_vm3, 2.0010006e-10, %v214_v27 }
  0x13   :  { %v60_v13 = vsel %vm237_vm0, %v52_v7, %v54_v11  ;;  %v61_v14 = vsel %vm241_vm1, %v53_v8, %v55_v12  ;;  %v62_v15 = vsel %vm237_vm0, %v54_v11, %v52_v7  ;;  %v63_v16 = vsel %vm241_vm1, %v55_v12, %v53_v8 }
  0x14   :  { %125 = vlog2.f32 %v60_v13  ;;  %v64_v17 = vmul.f32 %v62_v15, %v62_v15  ;;  %v65_v18 = vmul.f32 %v63_v16, %v63_v16  ;;  %v77_v33 = vsel %vm241_vm1, 0.2, %v75_v24 }
  0x15   :  { %127 = vlog2.f32 %v61_v14  ;;  %v80_v35 = vsel %vm237_vm0, 8.0040025e-10, %v78_v28  ;;  %v81_v36 = vsel %vm241_vm1, 8.0040025e-10, %v79_v31 }
  0x16   :  { %v66_v19 = vsub.f32 0.0, %v64_v17  ;;  %v67_v23 = vsub.f32 0.0, %v65_v18 }
  0x1a   :  { %v126_v22 = vpop.eup %125 }
  0x1b   :  { %v128_v25 = vpop.eup %127  ;;  %v69_v26 = vmul.f32 0.6931472, %v126_v22 }
  0x1c   :  { %v71_v29 = vmul.f32 0.6931472, %v128_v25 }
  0x1d   :  { %v72_v32 = vmul.f32 %v69_v26, %v66_v19 }
  0x1e   :  { %v73_v34 = vmul.f32 %v71_v29, %v67_v23 }
  0x1f   :  { %v82_v37 = vmul.f32 %v76_v30, %v72_v32 }
  0x20   :  { %v83_v38 = vmul.f32 %v77_v33, %v73_v34 }
  0x21   :  { %v84_v39 = vadd.f32 %v82_v37, %v80_v35 }
  0x22   :  { %v85_v40 = vadd.f32 %v83_v38, %v81_v36 }
  0x24   :  { %v86_v41 = vadd.f32 %v85_v40, %v84_v39 }
  0x26   :  { %v87_v42 = vrot.slane %v86_v41, 4 }
  0x28   :  { %v88_v43 = vadd.f32 %v87_v42, %v86_v41 }
  0x2a   :  { %v89_v44 = vrot.slane %v88_v43, 2 }
  0x2c   :  { %v90_v45 = vadd.f32 %v89_v44, %v88_v43 }
  0x2e   :  { %v91_v46 = vrot.slane %v90_v45, 1 }
  0x30   :  { %v92_v47 = vadd.f32 %v91_v46, %v90_v45 }
  0x32   :  { %93 = vst [vmem:[#allocation7] sm:$0x1] %v92_v47 }
  0x33   :  { %104 = dma.vmem_to_hbm [thread:$0]  %s100_s1, 16, %s102_s25, [#allocation4]  }
  0x34   :  { %205 = dma.done.wait [#allocation4], 16  }
  0x35   :  { %206 = vsyncadd [#allocation4], 4294967280 }
  0x36   :  { %109 = vsyncpa [#allocation3], 1 }
  0x37   :  { %110 = vsyncpa [#allocation6], 1 }
  0x38   :  { %111 = vsyncpa [#allocation4], 1 }

</bundles_post_ra>
